<compile_context>
chip_gen: v5e
topology: v5e:2x2
jax: 0.10.0
libtpu: 0.0.40
codegen_flags: <defaults>
</compile_context>

<pallas_src>
import functools

import jax
import jax.numpy as jnp
from jax.experimental import pallas as pl
from jax.experimental.pallas import tpu as pltpu


# ----------------------------------------------------------------------------
# Pallas kernel: one lane-dense block-diagonal matmul chain per batch tile.
# ----------------------------------------------------------------------------
def _rqs_params_nd_kernel(x_ref, w1_ref, b1_ref, wh_ref, bh_ref, wo_ref, bo_ref,
                          out_ref, *, n_extra):
    """x_ref  : (BT, F)
    w1_ref : (F,  F*H)      fused first layer (context-masked per column block)
    b1_ref : (1,  F*H)
    wh_ref : (Lp, F*H, F*H) block-diagonal extra hidden layers
    bh_ref : (Lp, 1,  F*H)
    wo_ref : (F*H, F*M)     block-diagonal output layer
    bo_ref : (1,  F*M)
    out_ref: (BT, F*M)
    """
    x = x_ref[...]                                               # (BT, F)
    h = jnp.maximum(
        jnp.dot(x, w1_ref[...], preferred_element_type=jnp.float32)
        + b1_ref[...], 0.0)                                      # (BT, F*H)
    for l in range(n_extra):
        h = jnp.maximum(
            jnp.dot(h, wh_ref[l], preferred_element_type=jnp.float32)
            + bh_ref[l], 0.0)                                    # (BT, F*H)
    out_ref[...] = (
        jnp.dot(h, wo_ref[...], preferred_element_type=jnp.float32)
        + bo_ref[...])                                           # (BT, F*M)


def rqs_params_nd(inputs, stacked, *, features, multiplier, hidden, n_hidden,
                  batch_tile=128):
    """Fused forward of RQSparamsND via a single pallas_call."""
    B, F = inputs.shape
    assert F == features
    H, M = hidden, multiplier
    L = max(n_hidden - 1, 0)
    Lp = max(L, 1)
    FH, FM = F * H, F * M

    w1, b1, wh, bh, wo, bo = stacked

    bt = min(batch_tile, B)
    assert B % bt == 0, "demo keeps B divisible by the batch tile"
    grid = (B // bt,)

    kernel = functools.partial(_rqs_params_nd_kernel, n_extra=L)

    flops = 2 * B * (F * FH + L * FH * FH + FH * FM)
    bytes_accessed = 4 * (B * F + B * FM
                          + F * FH + FH + Lp * (FH * FH + FH) + FH * FM + FM)
    cost = pl.CostEstimate(flops=flops, transcendentals=0,
                           bytes_accessed=bytes_accessed)

    return pl.pallas_call(
        kernel,
        out_shape=jax.ShapeDtypeStruct((B, FM), jnp.float32),
        grid=grid,
        in_specs=[
            pl.BlockSpec((bt, F), lambda b: (b, 0)),          # inputs: tiled
            pl.BlockSpec((F, FH), lambda b: (0, 0)),          # weights: resident
            pl.BlockSpec((1, FH), lambda b: (0, 0)),
            pl.BlockSpec((Lp, FH, FH), lambda b: (0, 0, 0)),
            pl.BlockSpec((Lp, 1, FH), lambda b: (0, 0, 0)),
            pl.BlockSpec((FH, FM), lambda b: (0, 0)),
            pl.BlockSpec((1, FM), lambda b: (0, 0)),
        ],
        out_specs=pl.BlockSpec((bt, FM), lambda b: (b, 0)),   # one full-width store
        compiler_params=pltpu.CompilerParams(
            dimension_semantics=("parallel",),                # megacore on v7x
            vmem_limit_bytes=32 * 1024 * 1024),               # safe on v7x 64 MiB
        cost_estimate=cost,
    )(inputs, w1, b1, wh, bh, wo, bo)


# ----------------------------------------------------------------------------
# Deterministic parameter construction (mirrors the module's __init__ shapes)
# ----------------------------------------------------------------------------
def init_raw_params(key, features, multiplier, hidden, n_hidden):
    """Per-net parameters exactly as the PyTorch module would own them."""
    L = n_hidden - 1

    def uniform(k, shape, fan_in):
        bound = 1.0 / jnp.sqrt(jnp.float32(fan_in))
        return jax.random.uniform(k, shape, jnp.float32, -bound, bound)

    keys = iter(jax.random.split(key, 4 + 8 * features * (n_hidden + 2)))

    # net 0: NeuralNet(1, hidden, multiplier, 1, out_act=Identity)
    net0 = dict(
        w1=uniform(next(keys), (hidden, 1), 1),
        b1=uniform(next(keys), (hidden,), 1),
        wo=uniform(next(keys), (multiplier, hidden), hidden),
        bo=uniform(next(keys), (multiplier,), hidden),
    )
    # nets i >= 1: RQSparams1D(1, multiplier, hidden, n_hidden, context=i)
    nets = []
    for i in range(1, features):
        net = dict(
            w1=uniform(next(keys), (hidden, i), i),
            b1=uniform(next(keys), (hidden,), i),
            hidden=[(uniform(next(keys), (hidden, hidden), hidden),
                     uniform(next(keys), (hidden,), hidden)) for _ in range(L)],
            wo=uniform(next(keys), (multiplier, hidden), hidden),
            bo=uniform(next(keys), (multiplier,), hidden),
        )
        nets.append(net)
    return net0, nets


def stack_params(net0, nets, *, features, multiplier, hidden, n_hidden):
    """Build the fused / block-diagonal weights used by the kernel."""
    L = max(n_hidden - 1, 0)
    Lp = max(L, 1)
    F, H, M = features, hidden, multiplier
    FH, FM = F * H, F * M

    w1 = jnp.zeros((F, FH), jnp.float32)        # net 0 column block stays zero
    b1 = jnp.zeros((1, FH), jnp.float32)
    wh = jnp.zeros((Lp, FH, FH), jnp.float32)
    bh = jnp.zeros((Lp, 1, FH), jnp.float32)
    wo = jnp.zeros((FH, FM), jnp.float32)
    bo = jnp.zeros((1, FM), jnp.float32)

    # net 0: zero W1 block (its true input is zeros), identity hidden blocks
    # (ReLU of a non-negative activation is the identity -> exact).
    b1 = b1.at[0, 0:H].set(net0["b1"])
    for l in range(Lp):
        wh = wh.at[l, 0:H, 0:H].set(jnp.eye(H, dtype=jnp.float32))
    wo = wo.at[0:H, 0:M].set(net0["wo"].T)
    bo = bo.at[0, 0:M].set(net0["bo"])

    # nets i >= 1: context weight occupies rows [0, i) of column block i.
    for i, net in enumerate(nets, start=1):
        w1 = w1.at[:i, i * H:(i + 1) * H].set(net["w1"].T)        # (i, H)
        b1 = b1.at[0, i * H:(i + 1) * H].set(net["b1"])
        for l, (whl, bhl) in enumerate(net["hidden"]):
            wh = wh.at[l, i * H:(i + 1) * H, i * H:(i + 1) * H].set(whl.T)
            bh = bh.at[l, 0, i * H:(i + 1) * H].set(bhl)
        wo = wo.at[i * H:(i + 1) * H, i * M:(i + 1) * M].set(net["wo"].T)
        bo = bo.at[0, i * M:(i + 1) * M].set(net["bo"])

    return w1, b1, wh, bh, wo, bo


# ----------------------------------------------------------------------------
# Pure-JAX reference reproducing the PyTorch forward exactly
# ----------------------------------------------------------------------------
def reference_forward(inputs, net0, nets):
    B = inputs.shape[0]
    z = jnp.zeros((B, 1), jnp.float32)
    h = jnp.maximum(z @ net0["w1"].T + net0["b1"], 0.0)
    outs = [h @ net0["wo"].T + net0["bo"]]
    for i, net in enumerate(nets, start=1):
        ctx = inputs[:, :i]
        h = jnp.maximum(ctx @ net["w1"].T + net["b1"], 0.0)
        for whl, bhl in net["hidden"]:
            h = jnp.maximum(h @ whl.T + bhl, 0.0)
        outs.append(h @ net["wo"].T + net["bo"])
    return jnp.concatenate(outs, axis=1)


# ----------------------------------------------------------------------------
if __name__ == "__main__":
    FEATURES = 4      # autoregressive dimension
    MULTIPLIER = 8    # per-feature parameter count
    HIDDEN = 32       # F*H = 128 -> exactly one vreg lane group per hidden pass
    N_HIDDEN = 2      # one extra hidden Linear+ReLU per conditional net
    BATCH = 256       # tiled into 128-row blocks -> grid of 2 batch steps

    key = jax.random.PRNGKey(0)
    k_params, k_x = jax.random.split(key)

    net0, nets = init_raw_params(k_params, FEATURES, MULTIPLIER, HIDDEN, N_HIDDEN)
    stacked = stack_params(net0, nets, features=FEATURES, multiplier=MULTIPLIER,
                           hidden=HIDDEN, n_hidden=N_HIDDEN)

    inputs = jax.random.normal(k_x, (BATCH, FEATURES), jnp.float32)

    out = rqs_params_nd(inputs, stacked, features=FEATURES,
                        multiplier=MULTIPLIER, hidden=HIDDEN,
                        n_hidden=N_HIDDEN, batch_tile=128)
    out = jax.block_until_ready(out)

    ref = reference_forward(inputs, net0, nets)
    assert out.shape == (BATCH, FEATURES * MULTIPLIER), out.shape
    assert jnp.allclose(out, ref, atol=1e-5, rtol=1e-5), (
        f"max abs err = {jnp.max(jnp.abs(out - ref))}")

    print("KERNEL_OK")
</pallas_src>

<mosaic_0001>
module attributes {stable_mosaic.version = 11 : i64} {
  func.func @_rqs_params_nd_kernel(%arg0: i32, %arg1: memref<128x4xf32, #tpu.memory_space<vmem>>, %arg2: memref<4x128xf32, #tpu.memory_space<vmem>>, %arg3: memref<1x128xf32, #tpu.memory_space<vmem>>, %arg4: memref<1x128x128xf32, #tpu.memory_space<vmem>>, %arg5: memref<1x1x128xf32, #tpu.memory_space<vmem>>, %arg6: memref<128x32xf32, #tpu.memory_space<vmem>>, %arg7: memref<1x32xf32, #tpu.memory_space<vmem>>, %arg8: memref<128x32xf32, #tpu.memory_space<vmem>>) attributes {dimension_semantics = [#tpu.dimension_semantics<parallel>], iteration_bounds = array<i64: 2>, scalar_prefetch = 0 : i64, scratch_operands = 0 : i64, tpu.core_type = #tpu.core_type<tc>, window_params = [{transform_indices = @transform_0, window_bounds = array<i64: 128, 4>}, {pipeline_mode = #tpu.pipeline_mode<synchronous>, transform_indices = @transform_1, window_bounds = array<i64: 4, 128>}, {pipeline_mode = #tpu.pipeline_mode<synchronous>, transform_indices = @transform_2, window_bounds = array<i64: 1, 128>}, {pipeline_mode = #tpu.pipeline_mode<synchronous>, transform_indices = @transform_3, window_bounds = array<i64: 1, 128, 128>}, {pipeline_mode = #tpu.pipeline_mode<synchronous>, transform_indices = @transform_4, window_bounds = array<i64: 1, 1, 128>}, {pipeline_mode = #tpu.pipeline_mode<synchronous>, transform_indices = @transform_5, window_bounds = array<i64: 128, 32>}, {pipeline_mode = #tpu.pipeline_mode<synchronous>, transform_indices = @transform_6, window_bounds = array<i64: 1, 32>}, {transform_indices = @transform_7, window_bounds = array<i64: 128, 32>}]} {
    %c0 = arith.constant 0 : index
    %c0_0 = arith.constant 0 : index
    %0 = vector.load %arg1[%c0, %c0_0] : memref<128x4xf32, #tpu.memory_space<vmem>>, vector<128x4xf32>
    %c0_1 = arith.constant 0 : index
    %c0_2 = arith.constant 0 : index
    %1 = vector.load %arg2[%c0_1, %c0_2] : memref<4x128xf32, #tpu.memory_space<vmem>>, vector<4x128xf32>
    %cst = arith.constant dense<0.000000e+00> : vector<128x128xf32>
    %2 = tpu.matmul %0, %1, %cst {dimension_numbers = #tpu.dot_dimension_numbers<[1], [0], [0], [1], [0, 0, 1, 1], [], []>} : vector<128x4xf32>, vector<4x128xf32>, vector<128x128xf32> -> vector<128x128xf32>
    %c0_3 = arith.constant 0 : index
    %c0_4 = arith.constant 0 : index
    %3 = vector.load %arg3[%c0_3, %c0_4] : memref<1x128xf32, #tpu.memory_space<vmem>>, vector<1x128xf32>
    %4 = vector.broadcast %3 : vector<1x128xf32> to vector<128x128xf32>
    %5 = arith.addf %2, %4 : vector<128x128xf32>
    %cst_5 = arith.constant 0.000000e+00 : f32
    %6 = vector.broadcast %cst_5 : f32 to vector<128x128xf32>
    %7 = arith.maximumf %5, %6 : vector<128x128xf32>
    %c0_6 = arith.constant 0 : index
    %c0_7 = arith.constant 0 : index
    %c0_8 = arith.constant 0 : index
    %8 = vector.load %arg4[%c0_6, %c0_7, %c0_8] : memref<1x128x128xf32, #tpu.memory_space<vmem>>, vector<1x128x128xf32>
    %9 = vector.shape_cast %8 : vector<1x128x128xf32> to vector<128x128xf32>
    %cst_9 = arith.constant dense<0.000000e+00> : vector<128x128xf32>
    %10 = tpu.matmul %7, %9, %cst_9 {dimension_numbers = #tpu.dot_dimension_numbers<[1], [0], [0], [1], [0, 0, 1, 1], [], []>} : vector<128x128xf32>, vector<128x128xf32>, vector<128x128xf32> -> vector<128x128xf32>
    %c0_10 = arith.constant 0 : index
    %c0_11 = arith.constant 0 : index
    %c0_12 = arith.constant 0 : index
    %11 = vector.load %arg5[%c0_10, %c0_11, %c0_12] : memref<1x1x128xf32, #tpu.memory_space<vmem>>, vector<1x1x128xf32>
    %12 = vector.shape_cast %11 : vector<1x1x128xf32> to vector<1x128xf32>
    %13 = vector.broadcast %12 : vector<1x128xf32> to vector<128x128xf32>
    %14 = arith.addf %10, %13 : vector<128x128xf32>
    %cst_13 = arith.constant 0.000000e+00 : f32
    %15 = vector.broadcast %cst_13 : f32 to vector<128x128xf32>
    %16 = arith.maximumf %14, %15 : vector<128x128xf32>
    %c0_14 = arith.constant 0 : index
    %c0_15 = arith.constant 0 : index
    %17 = vector.load %arg6[%c0_14, %c0_15] : memref<128x32xf32, #tpu.memory_space<vmem>>, vector<128x32xf32>
    %cst_16 = arith.constant dense<0.000000e+00> : vector<128x32xf32>
    %18 = tpu.matmul %16, %17, %cst_16 {dimension_numbers = #tpu.dot_dimension_numbers<[1], [0], [0], [1], [0, 0, 1, 1], [], []>} : vector<128x128xf32>, vector<128x32xf32>, vector<128x32xf32> -> vector<128x32xf32>
    %c0_17 = arith.constant 0 : index
    %c0_18 = arith.constant 0 : index
    %19 = vector.load %arg7[%c0_17, %c0_18] : memref<1x32xf32, #tpu.memory_space<vmem>>, vector<1x32xf32>
    %20 = vector.broadcast %19 : vector<1x32xf32> to vector<128x32xf32>
    %21 = arith.addf %18, %20 : vector<128x32xf32>
    %c0_19 = arith.constant 0 : index
    %c0_20 = arith.constant 0 : index
    %22 = vector.load %arg8[%c0_19, %c0_20] : memref<128x32xf32, #tpu.memory_space<vmem>>, vector<128x32xf32>
    tpu.vector_store %arg8[%c0_19, %c0_20], %21 {strides = array<i32>} : memref<128x32xf32, #tpu.memory_space<vmem>>, vector<128x32xf32>,
    return
  }
  func.func @transform_0(%arg0: i32) -> (i32, i32) {
    %c0_i32 = arith.constant 0 : i32
    %c0_i32_0 = arith.constant 0 : i32
    return %arg0, %c0_i32 : i32, i32
  }
  func.func @transform_1(%arg0: i32) -> (i32, i32) {
    %c0_i32 = arith.constant 0 : i32
    %c0_i32_0 = arith.constant 0 : i32
    %c0_i32_1 = arith.constant 0 : i32
    return %c0_i32, %c0_i32_0 : i32, i32
  }
  func.func @transform_2(%arg0: i32) -> (i32, i32) {
    %c0_i32 = arith.constant 0 : i32
    %c0_i32_0 = arith.constant 0 : i32
    %c0_i32_1 = arith.constant 0 : i32
    return %c0_i32, %c0_i32_0 : i32, i32
  }
  func.func @transform_3(%arg0: i32) -> (i32, i32, i32) {
    %c0_i32 = arith.constant 0 : i32
    %c0_i32_0 = arith.constant 0 : i32
    %c0_i32_1 = arith.constant 0 : i32
    %c0_i32_2 = arith.constant 0 : i32
    return %c0_i32, %c0_i32_0, %c0_i32_1 : i32, i32, i32
  }
  func.func @transform_4(%arg0: i32) -> (i32, i32, i32) {
    %c0_i32 = arith.constant 0 : i32
    %c0_i32_0 = arith.constant 0 : i32
    %c0_i32_1 = arith.constant 0 : i32
    %c0_i32_2 = arith.constant 0 : i32
    return %c0_i32, %c0_i32_0, %c0_i32_1 : i32, i32, i32
  }
  func.func @transform_5(%arg0: i32) -> (i32, i32) {
    %c0_i32 = arith.constant 0 : i32
    %c0_i32_0 = arith.constant 0 : i32
    %c0_i32_1 = arith.constant 0 : i32
    return %c0_i32, %c0_i32_0 : i32, i32
  }
  func.func @transform_6(%arg0: i32) -> (i32, i32) {
    %c0_i32 = arith.constant 0 : i32
    %c0_i32_0 = arith.constant 0 : i32
    %c0_i32_1 = arith.constant 0 : i32
    return %c0_i32, %c0_i32_0 : i32, i32
  }
  func.func @transform_7(%arg0: i32) -> (i32, i32) {
    %c0_i32 = arith.constant 0 : i32
    %c0_i32_0 = arith.constant 0 : i32
    return %arg0, %c0_i32 : i32, i32
  }
}

</mosaic_0001>

<bundles_post_ra>
// kernel: tpu_custom_call.1
= control target key start
LH: loop header
LB: loop body
LE: loop exit
PB: predicated region body
PF: predicated region fallthrough
CT: control target
= control target key end

     0   :  { %s815_s24 = smov 0   ;;  %s1033_s0 = inlined_call_operand.vmem [shape: f32[256,4], index: 0, kind: input, shape index: {}]   ;;  %s1034_s1 = inlined_call_operand.vmem [shape: f32[4,128], index: 1, kind: input, shape index: {}]   ;;  %s1035_s2 = inlined_call_operand.vmem [shape: f32[1,128], index: 2, kind: input, shape index: {}]   ;;  %s1036_s3 = inlined_call_operand.vmem [shape: f32[1,128,128], index: 3, kind: input, shape index: {}]   ;;  %s1037_s4 = inlined_call_operand.vmem [shape: f32[1,1,128], index: 4, kind: input, shape index: {}]   ;;  %s1038_s5 = inlined_call_operand.vmem [shape: f32[128,32], index: 5, kind: input, shape index: {}]   ;;  %s1039_s6 = inlined_call_operand.vmem [shape: f32[1,32], index: 6, kind: input, shape index: {}]   ;;  %s1040_s7 = inlined_call_operand.vmem [shape: f32[256,32], index: 7, kind: output, shape index: {}]  }
   0x1 LB: > { %s696_s25 = sadd.s32 4294967295, %s773_s24   ;;  %p700_p0 = scmp.ge.s32.totalorder %s773_s24, 1  ;;  %s773_s24 = sphi %s815_s24, %s17_s24  }
   0x2   : > { %p238_p1 = scmp.lt.s32.totalorder %s773_s24, 3 }
   0x4   : > { %p239_p2 = pnand %p700_p0, %p238_p1 }
   0x5   : > { %s701_s28 = sshll.u32 (!%p239_p2), %s696_s25, 4 }
   0x6   : > { %242 = sbr.rel (%p239_p2) target bundleno = 536 (0x218), region = 48  ;;  %p271_p3 = scmp.lt.s32.totalorder (!%p239_p2), %s701_s28, 31 }
   0xb   : > { %v298_v0 = vld [vmem:[%s1034_s1] sm:$0xf]  ;;  %vm352_vm0 = vcmask 1043456   ;;  %s1042_s28 = smov (!%p271_p3, %s701_s28), 31  ;;  %vm303_vm1 = vcmask 31744   ;;  %v452_v10 = vld [vmem:[%s1036_s3 + $0x78] sm:$0xff] }
   0xc   : > { %705 = vmatpush.msk.msra.mxu0 %vm352_vm0, %v298_v0  ;;  %s702_s29 = sshll.u32 %s1042_s28, 3  ;;  %v451_v11 = vld [vmem:[%s1036_s3 + $0x70] sm:$0xff]  ;;  %457 = vmatpush.msra.mxu1 %v452_v10  ;;  %v450_v12 = vld [vmem:[%s1036_s3 + $0x68] sm:$0xff]  ;;  %v449_v14 = vld [vmem:[%s1036_s3 + $0x60] sm:$0xff]  ;;  %vm623_vm2 = vcmask 261120  }
   0xd   : > { %s834_s9 = scalar_lea.vmem %s1033_s0, %s702_s29  ;;  %724 = vmatpush.msra.mxu3 %v452_v10  ;;  %v448_v15 = vld [vmem:[%s1036_s3 + $0x58] sm:$0xff]  ;;  %v447_v16 = vld [vmem:[%s1036_s3 + $0x50] sm:$0xff]  ;;  %v446_v17 = vld [vmem:[%s1036_s3 + $0x48] sm:$0xff]  ;;  %s996_s23 = scalar_lea.vmem %s1040_s7, %s702_s29 }
   0xe   : > { %v282_v1 = vld [vmem:[%s834_s9] sm:$0xff]  ;;  %v283_v2 = vld [vmem:[%s834_s9 + $0x8] sm:$0xff]  ;;  %v284_v3 = vld [vmem:[%s834_s9 + $0x10] sm:$0xff]  ;;  %458 = vmatpush.msra.mxu1 %v451_v11 }
   0xf   : > { %706 = vmatmul.msk.f32.vlgmr.msra.gmra.mxu0 %vm303_vm1, %v282_v1  ;;  %v285_v4 = vld [vmem:[%s834_s9 + $0x18] sm:$0xff]  ;;  %v286_v5 = vld [vmem:[%s834_s9 + $0x20] sm:$0xff]  ;;  %v287_v6 = vld [vmem:[%s834_s9 + $0x28] sm:$0xff]  ;;  %725 = vmatpush.msra.mxu3 %v451_v11 }
  0x10   : > { %v288_v7 = vld [vmem:[%s834_s9 + $0x30] sm:$0xff]  ;;  %v289_v8 = vld [vmem:[%s834_s9 + $0x38] sm:$0xff]  ;;  %v290_v9 = vld [vmem:[%s834_s9 + $0x40] sm:$0xff]  ;;  %459 = vmatpush.msra.mxu1 %v450_v12 }
  0x11   : > { %v291_v13 = vld [vmem:[%s834_s9 + $0x48] sm:$0xff]  ;;  %726 = vmatpush.msra.mxu3 %v450_v12  ;;  %v292_v18 = vld [vmem:[%s834_s9 + $0x50] sm:$0xff]  ;;  %v445_v19 = vld [vmem:[%s1036_s3 + $0x40] sm:$0xff] }
  0x12   : > { %460 = vmatpush.msra.mxu1 %v449_v14  ;;  %v444_v20 = vld [vmem:[%s1036_s3 + $0x38] sm:$0xff]  ;;  %v443_v21 = vld [vmem:[%s1036_s3 + $0x30] sm:$0xff]  ;;  %v442_v22 = vld [vmem:[%s1036_s3 + $0x28] sm:$0xff] }
  0x13   : > { %727 = vmatpush.msra.mxu3 %v449_v14  ;;  %v293_v23 = vld [vmem:[%s834_s9 + $0x58] sm:$0xff]  ;;  %v441_v24 = vld [vmem:[%s1036_s3 + $0x20] sm:$0xff]  ;;  %v439_v26 = vld [vmem:[%s1036_s3 + $0x10] sm:$0xff] }
  0x14   : > { %461 = vmatpush.msra.mxu1 %v448_v15  ;;  %v440_v25 = vld [vmem:[%s1036_s3 + $0x18] sm:$0xff]  ;;  %v294_v27 = vld [vmem:[%s834_s9 + $0x60] sm:$0xff]  ;;  %v438_v28 = vld [vmem:[%s1036_s3 + $0x8] sm:$0xff] }
  0x15   : > { %728 = vmatpush.msra.mxu3 %v448_v15  ;;  %v437_v29 = vld [vmem:[%s1036_s3] sm:$0xff]  ;;  %v295_v30 = vld [vmem:[%s834_s9 + $0x68] sm:$0xff]  ;;  %v296_v31 = vld [vmem:[%s834_s9 + $0x70] sm:$0xff] }
  0x16   : > { %462 = vmatpush.msra.mxu1 %v447_v16  ;;  %v297_v32 = vld [vmem:[%s834_s9 + $0x78] sm:$0xff]  ;;  %v919_v33 = vld [vmem:[%s1035_s2] ss:$0 sm:$0xff]  ;;  %v552_v0 = vld [vmem:[%s1038_s5 + $0x70] sm:$0xff] }
  0x17   : > { %707 = vmatmul.msk.f32.gmra.mxu0 %vm303_vm1, %v283_v2  ;;  %729 = vmatpush.msra.mxu3 %v447_v16  ;;  %v553_v61 = vld [vmem:[%s1038_s5 + $0x78] sm:$0xff]  ;;  %v551_v2 = vld [vmem:[%s1038_s5 + $0x68] sm:$0xff]  ;;  %v546_v10 = vld [vmem:[%s1038_s5 + $0x40] sm:$0xff] }
  0x18   : > { %463 = vmatpush.msra.mxu1 %v446_v17  ;;  %558 = vmatpush.msra.mxu2 %v553_v61  ;;  %v545_v11 = vld [vmem:[%s1038_s5 + $0x38] sm:$0xff]  ;;  %v544_v14 = vld [vmem:[%s1038_s5 + $0x30] sm:$0xff]  ;;  %v543_v16 = vld [vmem:[%s1038_s5 + $0x28] sm:$0xff] }
  0x19   : > { %730 = vmatpush.msra.mxu3 %v446_v17  ;;  %v542_v17 = vld [vmem:[%s1038_s5 + $0x20] sm:$0xff] }
  0x1a   : > { %464 = vmatpush.msra.mxu1 %v445_v19  ;;  %559 = vmatpush.msra.mxu2 %v552_v0 }
  0x1b   : > { %731 = vmatpush.msra.mxu3 %v445_v19 }
  0x1c   : > { %465 = vmatpush.msra.mxu1 %v444_v20  ;;  %560 = vmatpush.msra.mxu2 %v551_v2 }
  0x1d   : > { %732 = vmatpush.msra.mxu3 %v444_v20 }
  0x1e   : > { %466 = vmatpush.msra.mxu1 %v443_v21 }
  0x1f   : > { %708 = vmatmul.msk.f32.gmra.mxu0 %vm303_vm1, %v284_v3  ;;  %733 = vmatpush.msra.mxu3 %v443_v21  ;;  %v550_v3 = vld [vmem:[%s1038_s5 + $0x60] sm:$0xff]  ;;  %v540_v21 = vld [vmem:[%s1038_s5 + $0x10] sm:$0xff] }
  0x20   : > { %467 = vmatpush.msra.mxu1 %v442_v22  ;;  %561 = vmatpush.msra.mxu2 %v550_v3 }
  0x21   : > { %734 = vmatpush.msra.mxu3 %v442_v22 }
  0x22   : > { %468 = vmatpush.msra.mxu1 %v441_v24 }
  0x23   : > { %735 = vmatpush.msra.mxu3 %v441_v24  ;;  %v538_v24 = vld [vmem:[%s1038_s5] sm:$0xff] }
  0x24   : > { %469 = vmatpush.msra.mxu1 %v440_v25 }
  0x25   : > { %736 = vmatpush.msra.mxu3 %v440_v25 }
  0x26   : > { %470 = vmatpush.msra.mxu1 %v439_v26 }
  0x27   : > { %709 = vmatmul.msk.f32.gmra.mxu0 %vm303_vm1, %v285_v4  ;;  %737 = vmatpush.msra.mxu3 %v439_v26  ;;  %v549_v4 = vld [vmem:[%s1038_s5 + $0x58] sm:$0xff] }
  0x28   : > { %471 = vmatpush.msra.mxu1 %v438_v28  ;;  %562 = vmatpush.msra.mxu2 %v549_v4 }
  0x29   : > { %738 = vmatpush.msra.mxu3 %v438_v28 }
  0x2a   : > { %472 = vmatpush.msra.mxu1 %v437_v29 }
  0x2b   : > { %739 = vmatpush.msra.mxu3 %v437_v29 }
  0x2d   : > { %740 = vmatpush.msrb.mxu3 %v553_v61 }
  0x2f   : > { %710 = vmatmul.msk.f32.gmra.mxu0 %vm303_vm1, %v286_v5  ;;  %741 = vmatpush.msrb.mxu3 %v552_v0 }
  0x31   : > { %742 = vmatpush.msrb.mxu3 %v551_v2 }
  0x33   : > { %743 = vmatpush.msrb.mxu3 %v550_v3 }
  0x35   : > { %744 = vmatpush.msrb.mxu3 %v549_v4 }
  0x37   : > { %711 = vmatmul.msk.f32.gmra.mxu0 %vm303_vm1, %v287_v6 }
  0x3f   : > { %712 = vmatmul.msk.f32.gmra.mxu0 %vm303_vm1, %v288_v7  ;;  %v548_v7 = vld [vmem:[%s1038_s5 + $0x50] sm:$0xff] }
  0x40   : > { %563 = vmatpush.msra.mxu2 %v548_v7  ;;  %745 = vmatpush.msrb.mxu3 %v548_v7 }
  0x47   : > { %713 = vmatmul.msk.f32.gmra.mxu0 %vm303_vm1, %v289_v8 }
  0x4f   : > { %714 = vmatmul.msk.f32.gmra.mxu0 %vm303_vm1, %v290_v9  ;;  %v547_v9 = vld [vmem:[%s1038_s5 + $0x48] sm:$0xff] }
  0x50   : > { %564 = vmatpush.msra.mxu2 %v547_v9  ;;  %746 = vmatpush.msrb.mxu3 %v547_v9 }
  0x52   : > { %565 = vmatpush.msra.mxu2 %v546_v10  ;;  %747 = vmatpush.msrb.mxu3 %v546_v10 }
  0x54   : > { %566 = vmatpush.msra.mxu2 %v545_v11  ;;  %748 = vmatpush.msrb.mxu3 %v545_v11 }
  0x56   : > { %567 = vmatpush.msra.mxu2 %v544_v14  ;;  %749 = vmatpush.msrb.mxu3 %v544_v14 }
  0x57   : > { %715 = vmatmul.msk.f32.gmra.mxu0 %vm303_vm1, %v291_v13 }
  0x58   : > { %568 = vmatpush.msra.mxu2 %v543_v16  ;;  %750 = vmatpush.msrb.mxu3 %v543_v16 }
  0x5a   : > { %569 = vmatpush.msra.mxu2 %v542_v17  ;;  %751 = vmatpush.msrb.mxu3 %v542_v17 }
  0x5f   : > { %716 = vmatmul.msk.f32.gmra.mxu0 %vm303_vm1, %v292_v18  ;;  %v541_v18 = vld [vmem:[%s1038_s5 + $0x18] sm:$0xff] }
  0x60   : > { %570 = vmatpush.msra.mxu2 %v541_v18  ;;  %752 = vmatpush.msrb.mxu3 %v541_v18 }
  0x62   : > { %571 = vmatpush.msra.mxu2 %v540_v21  ;;  %753 = vmatpush.msrb.mxu3 %v540_v21 }
  0x67   : > { %717 = vmatmul.msk.f32.gmra.mxu0 %vm303_vm1, %v293_v23  ;;  %v539_v23 = vld [vmem:[%s1038_s5 + $0x8] sm:$0xff] }
  0x68   : > { %572 = vmatpush.msra.mxu2 %v539_v23  ;;  %754 = vmatpush.msrb.mxu3 %v539_v23 }
  0x6a   : > { %573 = vmatpush.msra.mxu2 %v538_v24  ;;  %755 = vmatpush.msrb.mxu3 %v538_v24 }
  0x6f   : > { %718 = vmatmul.msk.f32.gmra.mxu0 %vm303_vm1, %v294_v27 }
  0x77   : > { %719 = vmatmul.msk.f32.gmra.mxu0 %vm303_vm1, %v295_v30 }
  0x7f   : > { %720 = vmatmul.msk.f32.gmra.mxu0 %vm303_vm1, %v296_v31 }
  0x87   : > { %721 = vmatmul.msk.f32.gmra.mxu0 %vm303_vm1, %v297_v32 }
  0x8c   : > { %v373_v34 = vpop.f32.mrf.mxu0 }
  0x8d   : > { %v374_v35 = vadd.f32 %v919_v33, %v373_v34 }
  0x8f   : > { %v421_v36 = vmax.f32 %v374_v35, 0.0  ;;  %v765_v35 = vld [vmem:[%s1037_s4] ss:$0 sm:$0xff] }
  0x91   : > { %473 = vmatmul.f32.vlgmr.msra.gmra.mxu1 %v421_v36 }
  0x94   : > { %v376_v37 = vpop.f32.mrf.mxu0 }
  0x95   : > { %v377_v38 = vadd.f32 %v919_v33, %v376_v37 }
  0x97   : > { %v422_v39 = vmax.f32 %v377_v38, 0.0 }
  0x99   : > { %476 = vmatmul.f32.gmra.mxu1 %v422_v39 }
  0x9c   : > { %v379_v40 = vpop.f32.mrf.mxu0 }
  0x9d   : > { %v380_v41 = vadd.f32 %v919_v33, %v379_v40 }
  0x9f   : > { %v423_v42 = vmax.f32 %v380_v41, 0.0 }
  0xa1   : > { %479 = vmatmul.f32.gmra.mxu1 %v423_v42 }
  0xa4   : > { %v382_v43 = vpop.f32.mrf.mxu0 }
  0xa5   : > { %v383_v44 = vadd.f32 %v919_v33, %v382_v43 }
  0xa7   : > { %v424_v45 = vmax.f32 %v383_v44, 0.0 }
  0xa9   : > { %482 = vmatmul.f32.gmra.mxu1 %v424_v45 }
  0xac   : > { %v385_v46 = vpop.f32.mrf.mxu0 }
  0xad   : > { %v386_v47 = vadd.f32 %v919_v33, %v385_v46 }
  0xaf   : > { %v425_v48 = vmax.f32 %v386_v47, 0.0 }
  0xb1   : > { %485 = vmatmul.f32.gmra.mxu1 %v425_v48 }
  0xb4   : > { %v388_v49 = vpop.f32.mrf.mxu0 }
  0xb5   : > { %v389_v50 = vadd.f32 %v919_v33, %v388_v49 }
  0xb7   : > { %v426_v51 = vmax.f32 %v389_v50, 0.0 }
  0xb9   : > { %488 = vmatmul.f32.gmra.mxu1 %v426_v51 }
  0xbc   : > { %v391_v52 = vpop.f32.mrf.mxu0 }
  0xbd   : > { %v392_v53 = vadd.f32 %v919_v33, %v391_v52 }
  0xbf   : > { %v427_v54 = vmax.f32 %v392_v53, 0.0 }
  0xc1   : > { %491 = vmatmul.f32.gmra.mxu1 %v427_v54 }
  0xc4   : > { %v394_v55 = vpop.f32.mrf.mxu0 }
  0xc5   : > { %v395_v56 = vadd.f32 %v919_v33, %v394_v55 }
  0xc7   : > { %v428_v57 = vmax.f32 %v395_v56, 0.0 }
  0xc9   : > { %494 = vmatmul.f32.gmra.mxu1 %v428_v57 }
  0xcc   : > { %v397_v58 = vpop.f32.mrf.mxu0 }
  0xcd   : > { %v398_v59 = vadd.f32 %v919_v33, %v397_v58 }
  0xcf   : > { %v429_v60 = vmax.f32 %v398_v59, 0.0 }
  0xd1   : > { %497 = vmatmul.f32.gmra.mxu1 %v429_v60 }
  0xd4   : > { %v400_v62 = vpop.f32.mrf.mxu0 }
  0xd5   : > { %v401_v63 = vadd.f32 %v919_v33, %v400_v62 }
  0xd7   : > { %v430_v1 = vmax.f32 %v401_v63, 0.0 }
  0xd9   : > { %500 = vmatmul.f32.gmra.mxu1 %v430_v1 }
  0xdc   : > { %v403_v5 = vpop.f32.mrf.mxu0 }
  0xdd   : > { %v404_v6 = vadd.f32 %v919_v33, %v403_v5 }
  0xdf   : > { %v431_v8 = vmax.f32 %v404_v6, 0.0 }
  0xe1   : > { %503 = vmatmul.f32.gmra.mxu1 %v431_v8 }
  0xe4   : > { %v406_v12 = vpop.f32.mrf.mxu0 }
  0xe5   : > { %v407_v13 = vadd.f32 %v919_v33, %v406_v12 }
  0xe7   : > { %v432_v15 = vmax.f32 %v407_v13, 0.0 }
  0xe9   : > { %506 = vmatmul.f32.vlgmr.msra.gmra.mxu3 %v432_v15 }
  0xec   : > { %v409_v19 = vpop.f32.mrf.mxu0 }
  0xed   : > { %v410_v20 = vadd.f32 %v919_v33, %v409_v19  ;;  %v766_v19 = vld [vmem:[%s1039_s6] ss:$0 sm:$0xff] }
  0xef   : > { %v433_v22 = vmax.f32 %v410_v20, 0.0 }
  0xf1   : > { %509 = vmatmul.f32.gmra.mxu3 %v433_v22 }
  0xf4   : > { %v412_v25 = vpop.f32.mrf.mxu0 }
  0xf5   : > { %v413_v26 = vadd.f32 %v919_v33, %v412_v25 }
  0xf7   : > { %v434_v27 = vmax.f32 %v413_v26, 0.0 }
  0xf9   : > { %512 = vmatmul.f32.gmra.mxu3 %v434_v27 }
  0xfc   : > { %v415_v28 = vpop.f32.mrf.mxu0 }
  0xfd   : > { %v416_v29 = vadd.f32 %v919_v33, %v415_v28 }
  0xff   : > { %v435_v30 = vmax.f32 %v416_v29, 0.0 }
 0x101   : > { %515 = vmatmul.f32.gmra.mxu3 %v435_v30 }
 0x104   : > { %v418_v31 = vpop.f32.mrf.mxu0 }
 0x105   : > { %v419_v32 = vadd.f32 %v919_v33, %v418_v31 }
 0x107   : > { %v436_v34 = vmax.f32 %v419_v32, 0.0 }
 0x109   : > { %518 = vmatmul.f32.gmra.mxu3 %v436_v34 }
 0x10e   : > { %v474_v36 = vpop.f32.mrf.mxu1 }
 0x10f   : > { %v475_v37 = vadd.f32 %v765_v35, %v474_v36 }
 0x111   : > { %v522_v38 = vmax.f32 %v475_v37, 0.0 }
 0x113   : > { %574 = vmatmul.f32.vlgmr.msra.gmra.mxu2 %v522_v38 }
 0x116   : > { %v477_v39 = vpop.f32.mrf.mxu1 }
 0x117   : > { %v478_v40 = vadd.f32 %v765_v35, %v477_v39 }
 0x119   : > { %v523_v41 = vmax.f32 %v478_v40, 0.0 }
 0x11b   : > { %577 = vmatmul.f32.gmra.mxu2 %v523_v41 }
 0x11e   : > { %v480_v42 = vpop.f32.mrf.mxu1 }
 0x11f   : > { %v481_v43 = vadd.f32 %v765_v35, %v480_v42 }
 0x121   : > { %v524_v44 = vmax.f32 %v481_v43, 0.0 }
 0x123   : > { %580 = vmatmul.f32.gmra.mxu2 %v524_v44 }
 0x126   : > { %v483_v45 = vpop.f32.mrf.mxu1 }
 0x127   : > { %v484_v33 = vadd.f32 %v765_v35, %v483_v45 }
 0x129   : > { %v525_v46 = vmax.f32 %v484_v33, 0.0 }
 0x12b   : > { %583 = vmatmul.f32.gmra.mxu2 %v525_v46 }
 0x12e   : > { %v486_v47 = vpop.f32.mrf.mxu1 }
 0x12f   : > { %v487_v48 = vadd.f32 %v765_v35, %v486_v47 }
 0x131   : > { %v526_v49 = vmax.f32 %v487_v48, 0.0 }
 0x133   : > { %586 = vmatmul.f32.gmra.mxu2 %v526_v49 }
 0x136   : > { %v489_v50 = vpop.f32.mrf.mxu1 }
 0x137   : > { %v490_v51 = vadd.f32 %v765_v35, %v489_v50 }
 0x139   : > { %v527_v52 = vmax.f32 %v490_v51, 0.0 }
 0x13b   : > { %589 = vmatmul.f32.gmra.mxu2 %v527_v52 }
 0x13e   : > { %v492_v53 = vpop.f32.mrf.mxu1 }
 0x13f   : > { %v493_v54 = vadd.f32 %v765_v35, %v492_v53 }
 0x141   : > { %v528_v55 = vmax.f32 %v493_v54, 0.0 }
 0x143   : > { %592 = vmatmul.f32.gmra.mxu2 %v528_v55 }
 0x146   : > { %v495_v56 = vpop.f32.mrf.mxu1 }
 0x147   : > { %v496_v57 = vadd.f32 %v765_v35, %v495_v56 }
 0x149   : > { %v529_v58 = vmax.f32 %v496_v57, 0.0 }
 0x14b   : > { %595 = vmatmul.f32.gmra.mxu2 %v529_v58 }
 0x14e   : > { %v498_v59 = vpop.f32.mrf.mxu1 }
 0x14f   : > { %v499_v60 = vadd.f32 %v765_v35, %v498_v59 }
 0x151   : > { %v530_v61 = vmax.f32 %v499_v60, 0.0 }
 0x153   : > { %598 = vmatmul.f32.gmra.mxu2 %v530_v61 }
 0x156   : > { %v501_v62 = vpop.f32.mrf.mxu1 }
 0x157   : > { %v502_v63 = vadd.f32 %v765_v35, %v501_v62 }
 0x159   : > { %v531_v0 = vmax.f32 %v502_v63, 0.0 }
 0x15b   : > { %601 = vmatmul.f32.gmra.mxu2 %v531_v0 }
 0x15e   : > { %v504_v1 = vpop.f32.mrf.mxu1 }
 0x15f   : > { %v505_v2 = vadd.f32 %v765_v35, %v504_v1 }
 0x161   : > { %v532_v3 = vmax.f32 %v505_v2, 0.0 }
 0x163   : > { %604 = vmatmul.f32.gmra.mxu2 %v532_v3 }
 0x16c   : > { %v507_v4 = vpop.f32.mrf.mxu3 }
 0x16d   : > { %v508_v5 = vadd.f32 %v765_v35, %v507_v4 }
 0x16f   : > { %v533_v6 = vmax.f32 %v508_v5, 0.0 }
 0x171   : > { %607 = vmatmul.f32.vlgmr.msrb.gmra.mxu3 %v533_v6 }
 0x174   : > { %v510_v7 = vpop.f32.mrf.mxu3 }
 0x175   : > { %v511_v8 = vadd.f32 %v765_v35, %v510_v7 }
 0x177   : > { %v534_v9 = vmax.f32 %v511_v8, 0.0 }
 0x179   : > { %610 = vmatmul.f32.gmra.mxu3 %v534_v9 }
 0x17c   : > { %v513_v10 = vpop.f32.mrf.mxu3 }
 0x17d   : > { %v514_v11 = vadd.f32 %v765_v35, %v513_v10 }
 0x17f   : > { %v535_v12 = vmax.f32 %v514_v11, 0.0 }
 0x181   : > { %613 = vmatmul.f32.gmra.mxu3 %v535_v12 }
 0x184   : > { %v516_v13 = vpop.f32.mrf.mxu3 }
 0x185   : > { %v517_v14 = vadd.f32 %v765_v35, %v516_v13 }
 0x187   : > { %v536_v15 = vmax.f32 %v517_v14, 0.0 }
 0x189   : > { %616 = vmatmul.f32.gmra.mxu3 %v536_v15 }
 0x18c   : > { %v519_v16 = vpop.f32.mrf.mxu3 }
 0x18d   : > { %v520_v17 = vadd.f32 %v765_v35, %v519_v16 }
 0x18f   : > { %v537_v18 = vmax.f32 %v520_v17, 0.0 }
 0x191   : > { %619 = vmatmul.f32.gmra.mxu3 %v537_v18 }
 0x196   : > { %v575_v20 = vpop.f32.mrf.mxu2 }
 0x197   : > { %v576_v21 = vadd.f32 %v766_v19, %v575_v20 }
 0x199   : > { %624 = vst.msk [vmem:[%s996_s23] sm:$0xff] %vm623_vm2, %v576_v21 }
 0x19e   : > { %v578_v22 = vpop.f32.mrf.mxu2 }
 0x19f   : > { %v579_v23 = vadd.f32 %v766_v19, %v578_v22 }
 0x1a1   : > { %625 = vst.msk [vmem:[%s996_s23 + $0x8] sm:$0xff] %vm623_vm2, %v579_v23 }
 0x1a6   : > { %v581_v24 = vpop.f32.mrf.mxu2 }
 0x1a7   : > { %v582_v25 = vadd.f32 %v766_v19, %v581_v24 }
 0x1a9   : > { %626 = vst.msk [vmem:[%s996_s23 + $0x10] sm:$0xff] %vm623_vm2, %v582_v25 }
 0x1ae   : > { %v584_v26 = vpop.f32.mrf.mxu2 }
 0x1af   : > { %v585_v27 = vadd.f32 %v766_v19, %v584_v26 }
 0x1b1   : > { %627 = vst.msk [vmem:[%s996_s23 + $0x18] sm:$0xff] %vm623_vm2, %v585_v27 }
 0x1b6   : > { %v587_v28 = vpop.f32.mrf.mxu2 }
 0x1b7   : > { %v588_v29 = vadd.f32 %v766_v19, %v587_v28 }
 0x1b9   : > { %628 = vst.msk [vmem:[%s996_s23 + $0x20] sm:$0xff] %vm623_vm2, %v588_v29 }
 0x1be   : > { %v590_v30 = vpop.f32.mrf.mxu2 }
 0x1bf   : > { %v591_v31 = vadd.f32 %v766_v19, %v590_v30 }
 0x1c1   : > { %629 = vst.msk [vmem:[%s996_s23 + $0x28] sm:$0xff] %vm623_vm2, %v591_v31 }
 0x1c6   : > { %v593_v32 = vpop.f32.mrf.mxu2 }
 0x1c7   : > { %v594_v34 = vadd.f32 %v766_v19, %v593_v32 }
 0x1c9   : > { %630 = vst.msk [vmem:[%s996_s23 + $0x30] sm:$0xff] %vm623_vm2, %v594_v34 }
 0x1ce   : > { %v596_v35 = vpop.f32.mrf.mxu2 }
 0x1cf   : > { %v597_v36 = vadd.f32 %v766_v19, %v596_v35 }
 0x1d1   : > { %631 = vst.msk [vmem:[%s996_s23 + $0x38] sm:$0xff] %vm623_vm2, %v597_v36 }
 0x1d6   : > { %v599_v37 = vpop.f32.mrf.mxu2 }
 0x1d7   : > { %v600_v38 = vadd.f32 %v766_v19, %v599_v37 }
 0x1d9   : > { %632 = vst.msk [vmem:[%s996_s23 + $0x40] sm:$0xff] %vm623_vm2, %v600_v38 }
 0x1de   : > { %v602_v39 = vpop.f32.mrf.mxu2 }
 0x1df   : > { %v603_v40 = vadd.f32 %v766_v19, %v602_v39 }
 0x1e1   : > { %633 = vst.msk [vmem:[%s996_s23 + $0x48] sm:$0xff] %vm623_vm2, %v603_v40 }
 0x1e6   : > { %v605_v41 = vpop.f32.mrf.mxu2 }
 0x1e7   : > { %v606_v42 = vadd.f32 %v766_v19, %v605_v41 }
 0x1e9   : > { %634 = vst.msk [vmem:[%s996_s23 + $0x50] sm:$0xff] %vm623_vm2, %v606_v42 }
 0x1f4   : > { %v608_v43 = vpop.f32.mrf.mxu3 }
 0x1f5   : > { %v609_v44 = vadd.f32 %v766_v19, %v608_v43 }
 0x1f7   : > { %635 = vst.msk [vmem:[%s996_s23 + $0x58] sm:$0xff] %vm623_vm2, %v609_v44 }
 0x1fc   : > { %v611_v45 = vpop.f32.mrf.mxu3 }
 0x1fd   : > { %v612_v33 = vadd.f32 %v766_v19, %v611_v45 }
 0x1ff   : > { %636 = vst.msk [vmem:[%s996_s23 + $0x60] sm:$0xff] %vm623_vm2, %v612_v33 }
 0x204   : > { %v614_v46 = vpop.f32.mrf.mxu3 }
 0x205   : > { %v615_v47 = vadd.f32 %v766_v19, %v614_v46 }
 0x207   : > { %637 = vst.msk [vmem:[%s996_s23 + $0x68] sm:$0xff] %vm623_vm2, %v615_v47 }
 0x20c   : > { %v617_v48 = vpop.f32.mrf.mxu3 }
 0x20d   : > { %v618_v49 = vadd.f32 %v766_v19, %v617_v48 }
 0x20f   : > { %638 = vst.msk [vmem:[%s996_s23 + $0x70] sm:$0xff] %vm623_vm2, %v618_v49 }
 0x214   : > { %v620_v50 = vpop.f32.mrf.mxu3 }
 0x215   : > { %v621_v51 = vadd.f32 %v766_v19, %v620_v50 }
 0x217   : > { %639 = vst.msk [vmem:[%s996_s23 + $0x78] sm:$0xff] %vm623_vm2, %v621_v51 }
 0x218 PF: > { %s17_s24 = sadd.s32 1, %s773_s24  }
 0x219   : > { %p14_p4 = scmp.ge.s32.totalorder %s17_s24, 4  }
 0x21b   :  { %16 = sbr.rel (!%p14_p4) target bundleno = 1 (0x1), region = 78 }

</bundles_post_ra>
